<compile_context>
chip_gen: v5e
topology: v5e:2x2
jax: 0.10.0
libtpu: 0.0.40
codegen_flags: <defaults>
</compile_context>

<pallas_src>
import functools

import jax
import jax.numpy as jnp
from jax import lax
from jax.experimental import pallas as pl
from jax.experimental.pallas import tpu as pltpu

EPS = 1e-5          # nn.BatchNorm2d default
NEG_SLOPE = 0.1     # nn.LeakyReLU(0.1)


def _round_up(x, m):
    return (x + m - 1) // m * m


def _supports_single_buffering():
    """Feature-detect pipeline_mode=pl.Buffered(1) on BlockSpec."""
    if not hasattr(pl, "Buffered"):
        return False
    try:
        pl.BlockSpec((8, 128), lambda i: (0, 0), pipeline_mode=pl.Buffered(1))
        return True
    except Exception:
        return False


_HAS_BUFFERED = _supports_single_buffering()


def _resident_spec(block_shape, index_map):
    """BlockSpec for a block whose index never changes: single-buffer it."""
    if _HAS_BUFFERED:
        return pl.BlockSpec(block_shape, index_map, pipeline_mode=pl.Buffered(1))
    return pl.BlockSpec(block_shape, index_map)


def _vmem_capacity_bytes():
    try:
        return int(pltpu.get_tpu_info().vmem_capacity_bytes)
    except Exception:
        return 64 * 1024 * 1024     # v7x per-TC capacity (smallest generation)


# --------------------------------------------------------------------------
# Pass 1: conv matmul + per-tile partial channel statistics
# --------------------------------------------------------------------------
def _conv_stats_kernel(x_ref, w_ref, y_ref, stats_ref):
    # x_ref:     [TILE_M, Kd_pad]     im2col patch tile (compute dtype)
    # w_ref:     [Kd_pad, Cout_pad]   flattened conv weight (resident, 1-buffered)
    # y_ref:     [TILE_M, Cout_pad]   conv output staging tile (compute dtype)
    # stats_ref: [16, Cout_pad] f32   rows 0..7: sublane-partial sum,
    #                                 rows 8..15: sublane-partial sum of squares
    y = jnp.dot(x_ref[...], w_ref[...], preferred_element_type=jnp.float32)
    y_ref[...] = y.astype(y_ref.dtype)

    tm, cp = y.shape
    y3 = y.reshape(tm // 8, 8, cp)
    # VPU partial reduction down to 8 sublanes (stats taken from the f32
    # accumulator, not the quantized staging value); the final 8-row reduce is
    # a tiny host-side combine.  Direct sliced stores, no concatenate temp.
    stats_ref[0:8, :] = jnp.sum(y3, axis=0)
    stats_ref[8:16, :] = jnp.sum(y3 * y3, axis=0)


# --------------------------------------------------------------------------
# Pass 2: normalize (folded scale/shift) + LeakyReLU
# --------------------------------------------------------------------------
def _bn_act_kernel(y_ref, scale_ref, shift_ref, o_ref):
    # y_ref: [TILE_M, Cout_pad]; scale/shift: [1, Cout_pad] f32
    yn = y_ref[...].astype(jnp.float32) * scale_ref[...] + shift_ref[...]
    o_ref[...] = jnp.where(yn >= 0, yn, NEG_SLOPE * yn).astype(o_ref.dtype)


# --------------------------------------------------------------------------
# Host-side im2col (NCHW -> [M, Cin*k*k], Cin-major then kh,kw)
# --------------------------------------------------------------------------
def _im2col_nchw(x, k, stride, padding):
    n, cin, h, w = x.shape
    ho = (h + 2 * padding - k) // stride + 1
    wo = (w + 2 * padding - k) // stride + 1
    xp = jnp.pad(x, ((0, 0), (0, 0), (padding, padding), (padding, padding)))
    cols = []
    for di in range(k):
        for dj in range(k):
            cols.append(
                xp[:, :, di:di + stride * ho:stride, dj:dj + stride * wo:stride]
            )  # each [N, Cin, Ho, Wo]
    patches = jnp.stack(cols, axis=2)                    # [N, Cin, k*k, Ho, Wo]
    patches = patches.transpose(0, 3, 4, 1, 2)           # [N, Ho, Wo, Cin, k*k]
    return patches.reshape(n * ho * wo, cin * k * k), (n, ho, wo)


# --------------------------------------------------------------------------
# Wrapper
# --------------------------------------------------------------------------
@functools.partial(
    jax.jit,
    static_argnames=("kernel_size", "stride", "padding", "tile_m",
                     "tile_m_pass2", "compute_dtype", "out_dtype"),
)
def cnn_block(x, weight, gamma, beta, *, kernel_size, stride, padding,
              tile_m=512, tile_m_pass2=2048,
              compute_dtype=jnp.bfloat16, out_dtype=None):
    """Forward pass of CNNBlock (conv + training-mode BN + LeakyReLU(0.1)).

    x:      [N, Cin, H, W]    (NCHW, like PyTorch)
    weight: [Cout, Cin, k, k] conv weight (no bias)
    gamma:  [Cout]            BN weight
    beta:   [Cout]            BN bias
    returns [N, Cout, Ho, Wo] in `out_dtype` (default: x.dtype)

    compute_dtype: matmul-operand AND staging-buffer dtype.  bf16 is the fast
    default on all current generations (MXU is bf16-native, HBM traffic
    halves); pass jnp.float32 for strict tolerances.  Accumulation, BN stats
    and the normalize/activation epilogue are always f32.
    """
    cout, cin, k, _ = weight.shape
    compute_dtype = jnp.dtype(compute_dtype)
    out_dtype = jnp.dtype(out_dtype) if out_dtype is not None else x.dtype
    in_bytes = compute_dtype.itemsize
    y_dtype = compute_dtype                 # staging dtype for the conv output
    y_bytes = in_bytes
    out_bytes = jnp.dtype(out_dtype).itemsize

    patches, (n, ho, wo) = _im2col_nchw(x, k, stride, padding)   # [M, kd]
    m, kd = patches.shape

    # Pad the contraction dim only up to the dtype's sublane multiple (8 for
    # f32, 16 for bf16); Mosaic lane-pads to 128 inside VMEM for free.  Only
    # Cout is padded to 128 so the output stores stay lane-dense.
    sublane = 32 // in_bytes
    kd_pad = _round_up(kd, sublane)
    cout_pad = _round_up(cout, 128)

    capacity = _vmem_capacity_bytes()
    budget = int(capacity * 0.7)            # headroom for internal scratch
    wbuf = 1 if _HAS_BUFFERED else 2

    def pass1_need(tm):
        return (2 * tm * kd_pad * in_bytes            # double-buffered patch tiles
                + wbuf * kd_pad * cout_pad * in_bytes  # resident weight
                + 2 * tm * cout_pad * y_bytes          # staging output tiles
                + 2 * 16 * cout_pad * 4)               # stats tiles

    # Generation-aware M tile: shrink until the pass-1 working set fits.
    tm1 = _round_up(min(tile_m, _round_up(m, 8)), 8)
    while tm1 > 8 and pass1_need(tm1) > budget:
        tm1 = max(8, _round_up(tm1 // 2, 8))
    m_pad = _round_up(m, tm1)
    num_tiles1 = m_pad // tm1

    # Zero-padded rows/columns contribute 0 to the matmul and 0 to the channel
    # sums / sums-of-squares, so stats stay exact as long as we divide by the
    # true M below.
    patches_p = jnp.pad(patches, ((0, m_pad - m), (0, kd_pad - kd))
                        ).astype(compute_dtype)
    w_flat = weight.reshape(cout, cin * k * k).T                  # [kd, Cout]
    w_p = jnp.pad(w_flat, ((0, kd_pad - kd), (0, cout_pad - cout))
                  ).astype(compute_dtype)

    need1 = pass1_need(tm1)
    vmem_limit1 = int(min(capacity * 0.9, max(need1 * 1.3, 32 * 1024 * 1024)))

    # ---------------- Pass 1: conv + partial stats ----------------
    y_flat, stats = pl.pallas_call(
        _conv_stats_kernel,
        out_shape=(
            jax.ShapeDtypeStruct((m_pad, cout_pad), y_dtype),
            jax.ShapeDtypeStruct((num_tiles1 * 16, cout_pad), jnp.float32),
        ),
        grid_spec=pltpu.PrefetchScalarGridSpec(
            num_scalar_prefetch=0,
            grid=(num_tiles1,),
            in_specs=[
                pl.BlockSpec((tm1, kd_pad), lambda i: (i, 0)),
                _resident_spec((kd_pad, cout_pad), lambda i: (0, 0)),
            ],
            out_specs=(
                pl.BlockSpec((tm1, cout_pad), lambda i: (i, 0)),
                pl.BlockSpec((16, cout_pad), lambda i: (i, 0)),
            ),
        ),
        compiler_params=pltpu.CompilerParams(
            dimension_semantics=("parallel",),
            vmem_limit_bytes=vmem_limit1,
        ),
        cost_estimate=pl.CostEstimate(
            flops=2 * m_pad * kd_pad * cout_pad + 3 * m_pad * cout_pad,
            transcendentals=0,
            bytes_accessed=(m_pad * kd_pad * in_bytes
                            + kd_pad * cout_pad * in_bytes
                            + m_pad * cout_pad * y_bytes
                            + num_tiles1 * 16 * cout_pad * 4),
        ),
    )(patches_p, w_p)

    # ---------------- Tiny exact stats combine (plain JAX) ----------------
    st = stats.reshape(num_tiles1, 2, 8, cout_pad)
    ch_sum = jnp.sum(st[:, 0], axis=(0, 1))                     # [Cout_pad]
    ch_sq = jnp.sum(st[:, 1], axis=(0, 1))                      # [Cout_pad]
    inv_m = jnp.float32(1.0 / m)                                # true M, not padded
    mean = ch_sum * inv_m
    var = jnp.maximum(ch_sq * inv_m - mean * mean, 0.0)         # clamp cancellation
    inv_std = lax.rsqrt(var + EPS)

    gamma_p = jnp.pad(gamma.astype(jnp.float32), (0, cout_pad - cout))
    beta_p = jnp.pad(beta.astype(jnp.float32), (0, cout_pad - cout))
    scale = (gamma_p * inv_std).reshape(1, cout_pad)            # folded BN
    shift = (beta_p - mean * gamma_p * inv_std).reshape(1, cout_pad)

    # ---------------- Pass 2: normalize + LeakyReLU ----------------
    # Pass 2 is a trivially mem-bound stream: use a bigger M tile (a multiple
    # of tm1 dividing m_pad) to amortize per-step grid overhead.
    resident2 = (1 if _HAS_BUFFERED else 2) * 2 * cout_pad * 4

    def pass2_need(tm):
        return 2 * tm * cout_pad * (y_bytes + out_bytes) + resident2

    target_f = max(1, tile_m_pass2 // tm1)
    best_f = 1
    for f in range(min(target_f, num_tiles1), 0, -1):
        if num_tiles1 % f == 0 and pass2_need(tm1 * f) <= budget:
            best_f = f
            break
    tm2 = tm1 * best_f
    num_tiles2 = num_tiles1 // best_f

    need2 = pass2_need(tm2)
    vmem_limit2 = int(min(capacity * 0.9, max(need2 * 1.3, 32 * 1024 * 1024)))

    # Alias the output onto the staging buffer when dtypes match (same
    # shape/dtype) so we do not allocate a second m_pad*cout_pad HBM buffer.
    alias = {0: 0} if y_dtype == out_dtype else {}

    out_flat = pl.pallas_call(
        _bn_act_kernel,
        out_shape=jax.ShapeDtypeStruct((m_pad, cout_pad), out_dtype),
        grid_spec=pltpu.PrefetchScalarGridSpec(
            num_scalar_prefetch=0,
            grid=(num_tiles2,),
            in_specs=[
                pl.BlockSpec((tm2, cout_pad), lambda i: (i, 0)),
                _resident_spec((1, cout_pad), lambda i: (0, 0)),
                _resident_spec((1, cout_pad), lambda i: (0, 0)),
            ],
            out_specs=pl.BlockSpec((tm2, cout_pad), lambda i: (i, 0)),
        ),
        compiler_params=pltpu.CompilerParams(
            dimension_semantics=("parallel",),
            vmem_limit_bytes=vmem_limit2,
        ),
        input_output_aliases=alias,
        cost_estimate=pl.CostEstimate(
            flops=4 * m_pad * cout_pad,
            transcendentals=0,
            bytes_accessed=(m_pad * cout_pad * (y_bytes + out_bytes)
                            + 2 * cout_pad * 4),
        ),
    )(y_flat, scale, shift)

    # Un-pad (no-op slices when m_pad == m / cout_pad == cout) and return NCHW
    # like PyTorch.  TODO(synk): keep channels-last to drop this transpose.
    out = out_flat[:m, :cout].reshape(n, ho, wo, cout).transpose(0, 3, 1, 2)
    return out


# --------------------------------------------------------------------------
# Pure-JAX reference (conv + training-mode BN + leaky relu)
# --------------------------------------------------------------------------
def _reference(x, weight, gamma, beta, *, stride, padding):
    y = lax.conv_general_dilated(
        x, weight, window_strides=(stride, stride),
        padding=[(padding, padding), (padding, padding)],
        dimension_numbers=("NCHW", "OIHW", "NCHW"),
    )
    mean = jnp.mean(y, axis=(0, 2, 3), keepdims=True)
    var = jnp.mean((y - mean) ** 2, axis=(0, 2, 3), keepdims=True)
    yn = (y - mean) / jnp.sqrt(var + EPS)
    yn = yn * gamma.reshape(1, -1, 1, 1) + beta.reshape(1, -1, 1, 1)
    return jnp.where(yn >= 0, yn, NEG_SLOPE * yn)


if __name__ == "__main__":
    # Small, CNNBlock-consistent shapes: CNNBlock(in_channels=4, out_channels=8,
    # kernel_size=3, stride=1, padding=1) on x of shape [2, 4, 16, 16].
    N, CIN, H, W = 2, 4, 16, 16
    COUT, K, STRIDE, PAD = 8, 3, 1, 1

    key = jax.random.PRNGKey(0)
    kx, kw, kg, kb = jax.random.split(key, 4)
    x = jax.random.normal(kx, (N, CIN, H, W), dtype=jnp.float32)
    weight = jax.random.normal(kw, (COUT, CIN, K, K), dtype=jnp.float32) * 0.1
    gamma = 1.0 + 0.1 * jax.random.normal(kg, (COUT,), dtype=jnp.float32)
    beta = 0.1 * jax.random.normal(kb, (COUT,), dtype=jnp.float32)

    ref = _reference(x, weight, gamma, beta, stride=STRIDE, padding=PAD)

    # Strict f32 path; tile_m=128 exercises the multi-tile grid
    # (M = 2*16*16 = 512 -> 4 M-tiles) and the pass-2 output alias.
    out_f32 = cnn_block(x, weight, gamma, beta,
                        kernel_size=K, stride=STRIDE, padding=PAD,
                        tile_m=128, compute_dtype=jnp.float32)
    out_f32 = jax.block_until_ready(out_f32)
    assert out_f32.shape == (N, COUT, H, W), out_f32.shape
    assert jnp.allclose(out_f32, ref, atol=1e-3, rtol=1e-3), float(
        jnp.max(jnp.abs(out_f32 - ref)))

    # Default fast path: bf16 matmul operands + bf16 staging buffer
    # (f32 accumulation and f32 BN stats); looser tolerance by construction.
    out_bf16 = cnn_block(x, weight, gamma, beta,
                         kernel_size=K, stride=STRIDE, padding=PAD)
    out_bf16 = jax.block_until_ready(out_bf16)
    assert out_bf16.shape == (N, COUT, H, W), out_bf16.shape
    assert jnp.allclose(out_bf16, ref, atol=5e-2, rtol=5e-2), float(
        jnp.max(jnp.abs(out_bf16 - ref)))

    print("KERNEL_OK")
</pallas_src>

<mosaic_0001>
module attributes {stable_mosaic.version = 11 : i64} {
  func.func @_conv_stats_kernel(%arg0: i32, %arg1: memref<128x40xf32, #tpu.memory_space<vmem>>, %arg2: memref<40x128xf32, #tpu.memory_space<vmem>>, %arg3: memref<128x128xf32, #tpu.memory_space<vmem>>, %arg4: memref<16x128xf32, #tpu.memory_space<vmem>>) attributes {dimension_semantics = [#tpu.dimension_semantics<parallel>], iteration_bounds = array<i64: 4>, scalar_prefetch = 0 : i64, scratch_operands = 0 : i64, tpu.core_type = #tpu.core_type<tc>, window_params = [{transform_indices = @transform_0, window_bounds = array<i64: 128, 40>}, {pipeline_mode = #tpu.pipeline_mode<synchronous>, transform_indices = @transform_1, window_bounds = array<i64: 40, 128>}, {transform_indices = @transform_2, window_bounds = array<i64: 128, 128>}, {transform_indices = @transform_3, window_bounds = array<i64: 16, 128>}]} {
    %c0 = arith.constant 0 : index
    %c0_0 = arith.constant 0 : index
    %0 = vector.load %arg1[%c0, %c0_0] : memref<128x40xf32, #tpu.memory_space<vmem>>, vector<128x40xf32>
    %c0_1 = arith.constant 0 : index
    %c0_2 = arith.constant 0 : index
    %1 = vector.load %arg2[%c0_1, %c0_2] : memref<40x128xf32, #tpu.memory_space<vmem>>, vector<40x128xf32>
    %cst = arith.constant dense<0.000000e+00> : vector<128x128xf32>
    %2 = tpu.matmul %0, %1, %cst {dimension_numbers = #tpu.dot_dimension_numbers<[1], [0], [0], [1], [0, 0, 1, 1], [], []>} : vector<128x40xf32>, vector<40x128xf32>, vector<128x128xf32> -> vector<128x128xf32>
    %c0_3 = arith.constant 0 : index
    %c0_4 = arith.constant 0 : index
    %3 = vector.load %arg3[%c0_3, %c0_4] : memref<128x128xf32, #tpu.memory_space<vmem>>, vector<128x128xf32>
    tpu.vector_store %arg3[%c0_3, %c0_4], %2 {strides = array<i32>} : memref<128x128xf32, #tpu.memory_space<vmem>>, vector<128x128xf32>,
    %4 = vector.shape_cast %2 : vector<128x128xf32> to vector<16x8x128xf32>
    %cst_5 = arith.constant dense<0.000000e+00> : vector<8x128xf32>
    %5 = vector.multi_reduction <add>, %4, %cst_5 [0] : vector<16x8x128xf32> to vector<8x128xf32>
    %c0_6 = arith.constant 0 : index
    %c0_7 = arith.constant 0 : index
    %6 = vector.load %arg4[%c0_6, %c0_7] : memref<16x128xf32, #tpu.memory_space<vmem>>, vector<8x128xf32>
    tpu.vector_store %arg4[%c0_6, %c0_7], %5 {strides = array<i32>} : memref<16x128xf32, #tpu.memory_space<vmem>>, vector<8x128xf32>,
    %7 = arith.mulf %4, %4 : vector<16x8x128xf32>
    %cst_8 = arith.constant dense<0.000000e+00> : vector<8x128xf32>
    %8 = vector.multi_reduction <add>, %7, %cst_8 [0] : vector<16x8x128xf32> to vector<8x128xf32>
    %c8 = arith.constant 8 : index
    %c0_9 = arith.constant 0 : index
    %9 = vector.load %arg4[%c8, %c0_9] : memref<16x128xf32, #tpu.memory_space<vmem>>, vector<8x128xf32>
    tpu.vector_store %arg4[%c8, %c0_9], %8 {strides = array<i32>} : memref<16x128xf32, #tpu.memory_space<vmem>>, vector<8x128xf32>,
    return
  }
  func.func @transform_0(%arg0: i32) -> (i32, i32) {
    %c0_i32 = arith.constant 0 : i32
    %c0_i32_0 = arith.constant 0 : i32
    return %arg0, %c0_i32 : i32, i32
  }
  func.func @transform_1(%arg0: i32) -> (i32, i32) {
    %c0_i32 = arith.constant 0 : i32
    %c0_i32_0 = arith.constant 0 : i32
    %c0_i32_1 = arith.constant 0 : i32
    return %c0_i32, %c0_i32_0 : i32, i32
  }
  func.func @transform_2(%arg0: i32) -> (i32, i32) {
    %c0_i32 = arith.constant 0 : i32
    %c0_i32_0 = arith.constant 0 : i32
    return %arg0, %c0_i32 : i32, i32
  }
  func.func @transform_3(%arg0: i32) -> (i32, i32) {
    %c0_i32 = arith.constant 0 : i32
    %c0_i32_0 = arith.constant 0 : i32
    return %arg0, %c0_i32 : i32, i32
  }
}

module attributes {stable_mosaic.version = 11 : i64} {
  func.func @_bn_act_kernel(%arg0: i32, %arg1: memref<512x128xf32, #tpu.memory_space<vmem>>, %arg2: memref<1x128xf32, #tpu.memory_space<vmem>>, %arg3: memref<1x128xf32, #tpu.memory_space<vmem>>, %arg4: memref<512x128xf32, #tpu.memory_space<vmem>>) attributes {dimension_semantics = [#tpu.dimension_semantics<parallel>], iteration_bounds = array<i64: 1>, scalar_prefetch = 0 : i64, scratch_operands = 0 : i64, tpu.core_type = #tpu.core_type<tc>, window_params = [{transform_indices = @transform_0, window_bounds = array<i64: 512, 128>}, {pipeline_mode = #tpu.pipeline_mode<synchronous>, transform_indices = @transform_1, window_bounds = array<i64: 1, 128>}, {pipeline_mode = #tpu.pipeline_mode<synchronous>, transform_indices = @transform_2, window_bounds = array<i64: 1, 128>}, {transform_indices = @transform_3, window_bounds = array<i64: 512, 128>}]} {
    %c0 = arith.constant 0 : index
    %c0_0 = arith.constant 0 : index
    %0 = vector.load %arg1[%c0, %c0_0] : memref<512x128xf32, #tpu.memory_space<vmem>>, vector<512x128xf32>
    %c0_1 = arith.constant 0 : index
    %c0_2 = arith.constant 0 : index
    %1 = vector.load %arg2[%c0_1, %c0_2] : memref<1x128xf32, #tpu.memory_space<vmem>>, vector<1x128xf32>
    %2 = vector.broadcast %1 : vector<1x128xf32> to vector<512x128xf32>
    %3 = arith.mulf %0, %2 : vector<512x128xf32>
    %c0_3 = arith.constant 0 : index
    %c0_4 = arith.constant 0 : index
    %4 = vector.load %arg3[%c0_3, %c0_4] : memref<1x128xf32, #tpu.memory_space<vmem>>, vector<1x128xf32>
    %5 = vector.broadcast %4 : vector<1x128xf32> to vector<512x128xf32>
    %6 = arith.addf %3, %5 : vector<512x128xf32>
    %cst = arith.constant 0.000000e+00 : f32
    %7 = vector.broadcast %cst : f32 to vector<512x128xf32>
    %8 = arith.cmpf oge, %6, %7 : vector<512x128xf32>
    %cst_5 = arith.constant 1.000000e-01 : f32
    %9 = vector.broadcast %cst_5 : f32 to vector<512x128xf32>
    %10 = arith.mulf %9, %6 : vector<512x128xf32>
    %11 = arith.select %8, %6, %10 : vector<512x128xi1>, vector<512x128xf32>
    %c0_6 = arith.constant 0 : index
    %c0_7 = arith.constant 0 : index
    %12 = vector.load %arg4[%c0_6, %c0_7] : memref<512x128xf32, #tpu.memory_space<vmem>>, vector<512x128xf32>
    tpu.vector_store %arg4[%c0_6, %c0_7], %11 {strides = array<i32>} : memref<512x128xf32, #tpu.memory_space<vmem>>, vector<512x128xf32>,
    return
  }
  func.func @transform_0(%arg0: i32) -> (i32, i32) {
    %c0_i32 = arith.constant 0 : i32
    %c0_i32_0 = arith.constant 0 : i32
    return %arg0, %c0_i32 : i32, i32
  }
  func.func @transform_1(%arg0: i32) -> (i32, i32) {
    %c0_i32 = arith.constant 0 : i32
    %c0_i32_0 = arith.constant 0 : i32
    %c0_i32_1 = arith.constant 0 : i32
    return %c0_i32, %c0_i32_0 : i32, i32
  }
  func.func @transform_2(%arg0: i32) -> (i32, i32) {
    %c0_i32 = arith.constant 0 : i32
    %c0_i32_0 = arith.constant 0 : i32
    %c0_i32_1 = arith.constant 0 : i32
    return %c0_i32, %c0_i32_0 : i32, i32
  }
  func.func @transform_3(%arg0: i32) -> (i32, i32) {
    %c0_i32 = arith.constant 0 : i32
    %c0_i32_0 = arith.constant 0 : i32
    return %arg0, %c0_i32 : i32, i32
  }
}

</mosaic_0001>

<bundles_post_ra>
// kernel: cnn_block.2
= control target key start
LH: loop header
LB: loop body
LE: loop exit
PB: predicated region body
PF: predicated region fallthrough
CT: control target
= control target key end

     0   :  { %s557_s12 = smov 0   ;;  %s655_s0 = inlined_call_operand.vmem [shape: f32[512,40], index: 0, kind: input, shape index: {}]   ;;  %s656_s1 = inlined_call_operand.vmem [shape: f32[40,128], index: 1, kind: input, shape index: {}]   ;;  %s657_s2 = inlined_call_operand.vmem [shape: f32[512,128], index: 2, kind: output, shape index: {0}]   ;;  %s658_s3 = inlined_call_operand.vmem [shape: f32[64,128], index: 3, kind: output, shape index: {1}]  }
   0x1 LB: > { %s477_s13 = sadd.s32 4294967295, %s535_s12   ;;  %p481_p0 = scmp.ge.s32.totalorder %s535_s12, 1  ;;  %s535_s12 = sphi %s557_s12, %s14_s12  }
   0x2   : > { %p141_p1 = scmp.lt.s32.totalorder %s535_s12, 5 }
   0x4   : > { %p142_p2 = pnand %p481_p0, %p141_p1 }
   0x5   : > { %s482_s18 = sshll.u32 (!%p142_p2), %s477_s13, 4  ;;  %s486_s5 = sshll.u32 (!%p142_p2), %s477_s13, 1 }
   0x6   : > { %145 = sbr.rel (%p142_p2) target bundleno = 200 (0xc8), region = 28  ;;  %p171_p3 = scmp.lt.s32.totalorder (!%p142_p2), %s482_s18, 63 }
   0x7   : > { %p183_p4 = scmp.lt.s32.totalorder (!%p142_p2), %s486_s5, 7 }
   0xb   : > { %v208_v0 = vld [vmem:[%s656_s1 + $0x20] sm:$0xff]  ;;  %v207_v1 = vld [vmem:[%s656_s1 + $0x18] sm:$0xff]  ;;  %v206_v2 = vld [vmem:[%s656_s1 + $0x10] sm:$0xff]  ;;  %s660_s18 = smov (!%p171_p3, %s482_s18), 63  ;;  %vm209_vm0 = vcmask 326656   ;;  %s662_s5 = smov (!%p183_p4, %s486_s5), 7 }
   0xc   : > { %269 = vmatpush.msra.mxu0 %v208_v0  ;;  %506 = vmatpush.msra.mxu1 %v208_v0  ;;  %v205_v3 = vld [vmem:[%s656_s1 + $0x8] sm:$0xff]  ;;  %s483_s23 = sshll.u32 %s660_s18, 3  ;;  %v204_v4 = vld [vmem:[%s656_s1] sm:$0xff]  ;;  %s487_s6 = sshll.u32 %s662_s5, 3 }
   0xd   : > { %507 = vmatpush.msra.mxu2 %v208_v0  ;;  %508 = vmatpush.msra.mxu3 %v208_v0  ;;  %s590_s28 = scalar_lea.vmem %s655_s0, %s483_s23  ;;  %s629_s4 = scalar_lea.vmem %s657_s2, %s483_s23 }
   0xe   : > { %270 = vmatpush.msra.mxu0 %v207_v1  ;;  %509 = vmatpush.msra.mxu1 %v207_v1  ;;  %v188_v5 = vld [vmem:[%s590_s28] sm:$0xff]  ;;  %v189_v9 = vld [vmem:[%s590_s28 + $0x8] sm:$0xff]  ;;  %v190_v13 = vld [vmem:[%s590_s28 + $0x10] sm:$0xff]  ;;  %s186_s9 = scalar_lea.vmem %s658_s3, %s487_s6 }
   0xf   : > { %510 = vmatpush.msra.mxu2 %v207_v1  ;;  %511 = vmatpush.msra.mxu3 %v207_v1  ;;  %v192_v6 = vld [vmem:[%s590_s28 + $0x20] sm:$0xff]  ;;  %v193_v10 = vld [vmem:[%s590_s28 + $0x28] sm:$0xff]  ;;  %v194_v14 = vld [vmem:[%s590_s28 + $0x30] sm:$0xff] }
  0x10   : > { %271 = vmatpush.msra.mxu0 %v206_v2  ;;  %512 = vmatpush.msra.mxu1 %v206_v2  ;;  %v196_v7 = vld [vmem:[%s590_s28 + $0x40] sm:$0xff]  ;;  %v197_v11 = vld [vmem:[%s590_s28 + $0x48] sm:$0xff]  ;;  %v198_v15 = vld [vmem:[%s590_s28 + $0x50] sm:$0xff] }
  0x11   : > { %513 = vmatpush.msra.mxu2 %v206_v2  ;;  %514 = vmatpush.msra.mxu3 %v206_v2  ;;  %v200_v8 = vld [vmem:[%s590_s28 + $0x60] sm:$0xff]  ;;  %v201_v12 = vld [vmem:[%s590_s28 + $0x68] sm:$0xff]  ;;  %v202_v16 = vld [vmem:[%s590_s28 + $0x70] sm:$0xff] }
  0x12   : > { %272 = vmatpush.msra.mxu0 %v205_v3  ;;  %515 = vmatpush.msra.mxu1 %v205_v3  ;;  %v191_v17 = vld [vmem:[%s590_s28 + $0x18] sm:$0xff] }
  0x13   : > { %516 = vmatpush.msra.mxu2 %v205_v3  ;;  %517 = vmatpush.msra.mxu3 %v205_v3  ;;  %v195_v18 = vld [vmem:[%s590_s28 + $0x38] sm:$0xff] }
  0x14   : > { %273 = vmatpush.msra.mxu0 %v204_v4  ;;  %518 = vmatpush.msra.mxu1 %v204_v4  ;;  %v199_v19 = vld [vmem:[%s590_s28 + $0x58] sm:$0xff] }
  0x15   : > { %488 = vmatmul.msk.f32.vlgmr.msra.gmra.mxu0 %vm209_vm0, %v188_v5  ;;  %492 = vmatmul.msk.f32.vlgmr.msra.gmra.mxu1 %vm209_vm0, %v192_v6  ;;  %v203_v20 = vld [vmem:[%s590_s28 + $0x78] sm:$0xff] }
  0x16   : > { %519 = vmatpush.msra.mxu2 %v204_v4  ;;  %520 = vmatpush.msra.mxu3 %v204_v4 }
  0x17   : > { %496 = vmatmul.msk.f32.vlgmr.msra.gmra.mxu2 %vm209_vm0, %v196_v7  ;;  %500 = vmatmul.msk.f32.vlgmr.msra.gmra.mxu3 %vm209_vm0, %v200_v8 }
  0x1d   : > { %489 = vmatmul.msk.f32.gmra.mxu0 %vm209_vm0, %v189_v9  ;;  %493 = vmatmul.msk.f32.gmra.mxu1 %vm209_vm0, %v193_v10 }
  0x1f   : > { %497 = vmatmul.msk.f32.gmra.mxu2 %vm209_vm0, %v197_v11  ;;  %501 = vmatmul.msk.f32.gmra.mxu3 %vm209_vm0, %v201_v12 }
  0x25   : > { %490 = vmatmul.msk.f32.gmra.mxu0 %vm209_vm0, %v190_v13  ;;  %494 = vmatmul.msk.f32.gmra.mxu1 %vm209_vm0, %v194_v14 }
  0x27   : > { %498 = vmatmul.msk.f32.gmra.mxu2 %vm209_vm0, %v198_v15  ;;  %502 = vmatmul.msk.f32.gmra.mxu3 %vm209_vm0, %v202_v16 }
  0x2d   : > { %491 = vmatmul.msk.f32.gmra.mxu0 %vm209_vm0, %v191_v17  ;;  %495 = vmatmul.msk.f32.gmra.mxu1 %vm209_vm0, %v195_v18 }
  0x2f   : > { %499 = vmatmul.msk.f32.gmra.mxu2 %vm209_vm0, %v199_v19  ;;  %503 = vmatmul.msk.f32.gmra.mxu3 %vm209_vm0, %v203_v20 }
  0x92   : > { %v275_v21 = vpop.f32.mrf.mxu0  ;;  %v287_v22 = vpop.f32.mrf.mxu1 }
  0x93   : > { %323 = vst [vmem:[%s629_s4] sm:$0xff] %v275_v21  ;;  %v355_v32 = vmul.f32 %v275_v21, %v275_v21  ;;  %v359_v44 = vmul.f32 %v287_v22, %v287_v22 }
  0x94   : > { %327 = vst [vmem:[%s629_s4 + $0x20] sm:$0xff] %v287_v22 }
  0x9a   : > { %v278_v23 = vpop.f32.mrf.mxu0  ;;  %v290_v24 = vpop.f32.mrf.mxu1 }
  0x9b   : > { %324 = vst [vmem:[%s629_s4 + $0x8] sm:$0xff] %v278_v23  ;;  %v299_v25 = vpop.f32.mrf.mxu2  ;;  %v311_v26 = vpop.f32.mrf.mxu3  ;;  %v356_v31 = vmul.f32 %v278_v23, %v278_v23  ;;  %v339_v33 = vadd.f32 %v278_v23, %v275_v21  ;;  %v360_v47 = vmul.f32 %v290_v24, %v290_v24 }
  0x9c   : > { %328 = vst [vmem:[%s629_s4 + $0x28] sm:$0xff] %v290_v24  ;;  %v363_v58 = vmul.f32 %v299_v25, %v299_v25  ;;  %v367_v6 = vmul.f32 %v311_v26, %v311_v26 }
  0x9d   : > { %331 = vst [vmem:[%s629_s4 + $0x40] sm:$0xff] %v299_v25  ;;  %v371_v35 = vadd.f32 %v356_v31, %v355_v32 }
  0x9e   : > { %335 = vst [vmem:[%s629_s4 + $0x60] sm:$0xff] %v311_v26 }
  0xa2   : > { %v281_v27 = vpop.f32.mrf.mxu0  ;;  %v293_v28 = vpop.f32.mrf.mxu1 }
  0xa3   : > { %325 = vst [vmem:[%s629_s4 + $0x10] sm:$0xff] %v281_v27  ;;  %v302_v29 = vpop.f32.mrf.mxu2  ;;  %v314_v30 = vpop.f32.mrf.mxu3  ;;  %v357_v34 = vmul.f32 %v281_v27, %v281_v27  ;;  %v340_v36 = vadd.f32 %v339_v33, %v281_v27  ;;  %v361_v51 = vmul.f32 %v293_v28, %v293_v28 }
  0xa4   : > { %329 = vst [vmem:[%s629_s4 + $0x30] sm:$0xff] %v293_v28  ;;  %v364_v61 = vmul.f32 %v302_v29, %v302_v29  ;;  %v368_v9 = vmul.f32 %v314_v30, %v314_v30 }
  0xa5   : > { %332 = vst [vmem:[%s629_s4 + $0x48] sm:$0xff] %v302_v29  ;;  %v372_v39 = vadd.f32 %v371_v35, %v357_v34 }
  0xa6   : > { %336 = vst [vmem:[%s629_s4 + $0x68] sm:$0xff] %v314_v30 }
  0xaa   : > { %v284_v37 = vpop.f32.mrf.mxu0  ;;  %v296_v38 = vpop.f32.mrf.mxu1 }
  0xab   : > { %326 = vst [vmem:[%s629_s4 + $0x18] sm:$0xff] %v284_v37  ;;  %v341_v40 = vadd.f32 %v340_v36, %v284_v37  ;;  %v358_v41 = vmul.f32 %v284_v37, %v284_v37  ;;  %v305_v42 = vpop.f32.mrf.mxu2  ;;  %v317_v43 = vpop.f32.mrf.mxu3  ;;  %v362_v53 = vmul.f32 %v296_v38, %v296_v38 }
  0xac   : > { %330 = vst [vmem:[%s629_s4 + $0x38] sm:$0xff] %v296_v38  ;;  %v365_v1 = vmul.f32 %v305_v42, %v305_v42  ;;  %v369_v13 = vmul.f32 %v317_v43, %v317_v43 }
  0xad   : > { %v342_v45 = vadd.f32 %v341_v40, %v287_v22  ;;  %v373_v46 = vadd.f32 %v372_v39, %v358_v41  ;;  %333 = vst [vmem:[%s629_s4 + $0x50] sm:$0xff] %v305_v42 }
  0xae   : > { %337 = vst [vmem:[%s629_s4 + $0x70] sm:$0xff] %v317_v43 }
  0xaf   : > { %v374_v48 = vadd.f32 %v373_v46, %v359_v44  ;;  %v343_v49 = vadd.f32 %v342_v45, %v290_v24 }
  0xb1   : > { %v344_v50 = vadd.f32 %v343_v49, %v293_v28  ;;  %v375_v52 = vadd.f32 %v374_v48, %v360_v47 }
  0xb3   : > { %v376_v54 = vadd.f32 %v375_v52, %v361_v51  ;;  %v345_v55 = vadd.f32 %v344_v50, %v296_v38  ;;  %v308_v56 = vpop.f32.mrf.mxu2  ;;  %v320_v57 = vpop.f32.mrf.mxu3 }
  0xb4   : > { %334 = vst [vmem:[%s629_s4 + $0x58] sm:$0xff] %v308_v56  ;;  %v366_v3 = vmul.f32 %v308_v56, %v308_v56  ;;  %v370_v15 = vmul.f32 %v320_v57, %v320_v57 }
  0xb5   : > { %v346_v59 = vadd.f32 %v345_v55, %v299_v25  ;;  %v377_v60 = vadd.f32 %v376_v54, %v362_v53  ;;  %338 = vst [vmem:[%s629_s4 + $0x78] sm:$0xff] %v320_v57 }
  0xb7   : > { %v378_v62 = vadd.f32 %v377_v60, %v363_v58  ;;  %v347_v63 = vadd.f32 %v346_v59, %v302_v29 }
  0xb9   : > { %v348_v0 = vadd.f32 %v347_v63, %v305_v42  ;;  %v379_v2 = vadd.f32 %v378_v62, %v364_v61 }
  0xbb   : > { %v380_v4 = vadd.f32 %v379_v2, %v365_v1  ;;  %v349_v5 = vadd.f32 %v348_v0, %v308_v56 }
  0xbd   : > { %v350_v7 = vadd.f32 %v349_v5, %v311_v26  ;;  %v381_v8 = vadd.f32 %v380_v4, %v366_v3 }
  0xbf   : > { %v382_v10 = vadd.f32 %v381_v8, %v367_v6  ;;  %v351_v11 = vadd.f32 %v350_v7, %v314_v30 }
  0xc1   : > { %v352_v12 = vadd.f32 %v351_v11, %v317_v43  ;;  %v383_v14 = vadd.f32 %v382_v10, %v368_v9 }
  0xc3   : > { %v384_v16 = vadd.f32 %v383_v14, %v369_v13  ;;  %v353_v17 = vadd.f32 %v352_v12, %v320_v57 }
  0xc5   : > { %354 = vst [vmem:[%s186_s9] sm:$0xff] %v353_v17  ;;  %v385_v18 = vadd.f32 %v384_v16, %v370_v15 }
  0xc7   : > { %386 = vst [vmem:[%s186_s9 + $0x8] sm:$0xff] %v385_v18 }
  0xc8 PF: > { %s14_s12 = sadd.s32 1, %s535_s12  }
  0xc9   : > { %p11_p5 = scmp.ge.s32.totalorder %s14_s12, 6  }
  0xcb   :  { %13 = sbr.rel (!%p11_p5) target bundleno = 1 (0x1), region = 70 }

// kernel: cnn_block.3
= control target key start
LH: loop header
LB: loop body
LE: loop exit
PB: predicated region body
PF: predicated region fallthrough
CT: control target
= control target key end

     0   :  { %s1020_s0 = inlined_call_operand.vmem [shape: f32[512,128], index: 0, kind: input, shape index: {}, may-alias: {0,3}]   ;;  %s1021_s1 = inlined_call_operand.vmem [shape: f32[1,128], index: 1, kind: input, shape index: {}]   ;;  %s1022_s2 = inlined_call_operand.vmem [shape: f32[1,128], index: 2, kind: input, shape index: {}]   ;;  %s1023_s3 = inlined_call_operand.vmem [shape: f32[512,128], index: 3, kind: output, shape index: {}, may-alias: {0,3}]  }
   0x1   :  { %v14_v0 = vld [vmem:[%s1020_s0] sm:$0xff]  ;;  %v15_v3 = vld [vmem:[%s1020_s0 + $0x8] sm:$0xff]  ;;  %v16_v6 = vld [vmem:[%s1020_s0 + $0x10] sm:$0xff] }
   0x2   :  { %v502_v1 = vld [vmem:[%s1021_s1] ss:$0 sm:$0xff]  ;;  %v17_v7 = vld [vmem:[%s1020_s0 + $0x18] sm:$0xff]  ;;  %v19_v12 = vld [vmem:[%s1020_s0 + $0x28] sm:$0xff] }
   0x3   :  { %v507_v2 = vld [vmem:[%s1022_s2] ss:$0 sm:$0xff]  ;;  %v82_v4 = vmul.f32 %v502_v1, %v14_v0  ;;  %v83_v5 = vmul.f32 %v502_v1, %v15_v3  ;;  %v84_v9 = vmul.f32 %v502_v1, %v16_v6  ;;  %v85_v10 = vmul.f32 %v502_v1, %v17_v7  ;;  %v20_v13 = vld [vmem:[%s1020_s0 + $0x30] sm:$0xff]  ;;  %v21_v14 = vld [vmem:[%s1020_s0 + $0x38] sm:$0xff] }
   0x4   :  { %v18_v8 = vld [vmem:[%s1020_s0 + $0x20] sm:$0xff]  ;;  %v87_v17 = vmul.f32 %v502_v1, %v19_v12  ;;  %v88_v18 = vmul.f32 %v502_v1, %v20_v13  ;;  %v89_v22 = vmul.f32 %v502_v1, %v21_v14  ;;  %v23_v24 = vld [vmem:[%s1020_s0 + $0x48] sm:$0xff]  ;;  %v24_v32 = vld [vmem:[%s1020_s0 + $0x50] sm:$0xff] }
   0x5   :  { %v86_v11 = vmul.f32 %v502_v1, %v18_v8  ;;  %v150_v15 = vadd.f32 %v507_v2, %v82_v4  ;;  %v151_v16 = vadd.f32 %v507_v2, %v83_v5  ;;  %v152_v19 = vadd.f32 %v507_v2, %v84_v9  ;;  %v22_v23 = vld [vmem:[%s1020_s0 + $0x40] sm:$0xff] }
   0x6   :  { %v153_v20 = vadd.f32 %v507_v2, %v85_v10  ;;  %v155_v35 = vadd.f32 %v507_v2, %v87_v17  ;;  %v156_v36 = vadd.f32 %v507_v2, %v88_v18  ;;  %v157_v38 = vadd.f32 %v507_v2, %v89_v22 }
   0x7   :  { %v154_v21 = vadd.f32 %v507_v2, %v86_v11  ;;  %vm214_vm0 = vcmp.ge.f32.partialorder %v150_v15, 0.0  ;;  %v278_v25 = vmul.f32 0.1, %v150_v15  ;;  %vm215_vm1 = vcmp.ge.f32.partialorder %v151_v16, 0.0 }
   0x8   :  { %v279_v26 = vmul.f32 0.1, %v151_v16  ;;  %vm216_vm2 = vcmp.ge.f32.partialorder %v152_v19, 0.0  ;;  %v280_v27 = vmul.f32 0.1, %v152_v19  ;;  %vm217_vm3 = vcmp.ge.f32.partialorder %v153_v20, 0.0 }
   0x9   :  { %v281_v28 = vmul.f32 0.1, %v153_v20  ;;  %v342_v29 = vsel %vm214_vm0, %v150_v15, %v278_v25  ;;  %vm218_vm4 = vcmp.ge.f32.partialorder %v154_v21, 0.0  ;;  %v282_v31 = vmul.f32 0.1, %v154_v21 }
   0xa   :  { %v343_v30 = vsel %vm215_vm1, %v151_v16, %v279_v26  ;;  %406 = vst [vmem:[%s1023_s3] sm:$0xff] %v342_v29  ;;  %v344_v33 = vsel %vm216_vm2, %v152_v19, %v280_v27  ;;  %v90_v39 = vmul.f32 %v502_v1, %v22_v23  ;;  %v91_v40 = vmul.f32 %v502_v1, %v23_v24 }
   0xb   :  { %v345_v34 = vsel %vm217_vm3, %v153_v20, %v281_v28  ;;  %407 = vst [vmem:[%s1023_s3 + $0x8] sm:$0xff] %v343_v30  ;;  %v346_v37 = vsel %vm218_vm4, %v154_v21, %v282_v31  ;;  %vm219_vm5 = vcmp.ge.f32.partialorder %v155_v35, 0.0  ;;  %v283_v42 = vmul.f32 0.1, %v155_v35 }
   0xc   :  { %vm220_vm6 = vcmp.ge.f32.partialorder %v156_v36, 0.0  ;;  %v92_v43 = vmul.f32 %v502_v1, %v24_v32  ;;  %v284_v44 = vmul.f32 0.1, %v156_v36  ;;  %vm221_vm7 = vcmp.ge.f32.partialorder %v157_v38, 0.0 }
   0xd   :  { %v285_v45 = vmul.f32 0.1, %v157_v38  ;;  %v158_v46 = vadd.f32 %v507_v2, %v90_v39  ;;  %v347_v47 = vsel %vm219_vm5, %v155_v35, %v283_v42  ;;  %v159_v48 = vadd.f32 %v507_v2, %v91_v40 }
   0xe   :  { %v160_v49 = vadd.f32 %v507_v2, %v92_v43  ;;  %v348_v53 = vsel %vm220_vm6, %v156_v36, %v284_v44 }
   0xf   :  { %v349_v54 = vsel %vm221_vm7, %v157_v38, %v285_v45  ;;  %vm222_vm8 = vcmp.ge.f32.partialorder %v158_v46, 0.0  ;;  %v286_v55 = vmul.f32 0.1, %v158_v46  ;;  %vm223_vm9 = vcmp.ge.f32.partialorder %v159_v48, 0.0 }
  0x10   :  { %v287_v57 = vmul.f32 0.1, %v159_v48  ;;  %vm224_vm10 = vcmp.ge.f32.partialorder %v160_v49, 0.0  ;;  %v288_v61 = vmul.f32 0.1, %v160_v49 }
  0x11   :  { %v350_v60 = vsel %vm222_vm8, %v158_v46, %v286_v55 }
  0x12   :  { %v25_v41 = vld [vmem:[%s1020_s0 + $0x58] sm:$0xff]  ;;  %v351_v4 = vsel %vm223_vm9, %v159_v48, %v287_v57  ;;  %v352_v7 = vsel %vm224_vm10, %v160_v49, %v288_v61 }
  0x13   :  { %408 = vst [vmem:[%s1023_s3 + $0x10] sm:$0xff] %v344_v33  ;;  %v93_v50 = vmul.f32 %v502_v1, %v25_v41 }
  0x14   :  { %409 = vst [vmem:[%s1023_s3 + $0x18] sm:$0xff] %v345_v34 }
  0x15   :  { %410 = vst [vmem:[%s1023_s3 + $0x20] sm:$0xff] %v346_v37  ;;  %v161_v58 = vadd.f32 %v507_v2, %v93_v50 }
  0x17   :  { %vm225_vm11 = vcmp.ge.f32.partialorder %v161_v58, 0.0  ;;  %v289_v5 = vmul.f32 0.1, %v161_v58 }
  0x19   :  { %v353_v11 = vsel %vm225_vm11, %v161_v58, %v289_v5 }
  0x1c   :  { %v26_v51 = vld [vmem:[%s1020_s0 + $0x60] sm:$0xff]  ;;  %v27_v52 = vld [vmem:[%s1020_s0 + $0x68] sm:$0xff] }
  0x1d   :  { %411 = vst [vmem:[%s1023_s3 + $0x28] sm:$0xff] %v347_v47  ;;  %v94_v62 = vmul.f32 %v502_v1, %v26_v51  ;;  %v95_v63 = vmul.f32 %v502_v1, %v27_v52 }
  0x1f   :  { %v162_v8 = vadd.f32 %v507_v2, %v94_v62  ;;  %v163_v9 = vadd.f32 %v507_v2, %v95_v63 }
  0x21   :  { %vm226_vm12 = vcmp.ge.f32.partialorder %v162_v8, 0.0  ;;  %v290_v15 = vmul.f32 0.1, %v162_v8  ;;  %vm227_vm13 = vcmp.ge.f32.partialorder %v163_v9, 0.0  ;;  %v291_v17 = vmul.f32 0.1, %v163_v9 }
  0x23   :  { %v354_v21 = vsel %vm226_vm12, %v162_v8, %v290_v15  ;;  %v355_v27 = vsel %vm227_vm13, %v163_v9, %v291_v17 }
  0x24   :  { %v28_v56 = vld [vmem:[%s1020_s0 + $0x70] sm:$0xff] }
  0x25   :  { %412 = vst [vmem:[%s1023_s3 + $0x30] sm:$0xff] %v348_v53  ;;  %v96_v6 = vmul.f32 %v502_v1, %v28_v56 }
  0x27   :  { %v164_v12 = vadd.f32 %v507_v2, %v96_v6 }
  0x29   :  { %vm228_vm14 = vcmp.ge.f32.partialorder %v164_v12, 0.0  ;;  %v292_v18 = vmul.f32 0.1, %v164_v12 }
  0x2b   :  { %v356_v28 = vsel %vm228_vm14, %v164_v12, %v292_v18 }
  0x2c   :  { %v29_v59 = vld [vmem:[%s1020_s0 + $0x78] sm:$0xff] }
  0x2d   :  { %413 = vst [vmem:[%s1023_s3 + $0x38] sm:$0xff] %v349_v54  ;;  %v97_v10 = vmul.f32 %v502_v1, %v29_v59 }
  0x2f   :  { %v165_v16 = vadd.f32 %v507_v2, %v97_v10 }
  0x31   :  { %vm229_vm15 = vcmp.ge.f32.partialorder %v165_v16, 0.0  ;;  %v293_v22 = vmul.f32 0.1, %v165_v16 }
  0x33   :  { %v357_v32 = vsel %vm229_vm15, %v165_v16, %v293_v22 }
  0x34   :  { %v30_v0 = vld [vmem:[%s1020_s0 + $0x80] sm:$0xff]  ;;  %v31_v3 = vld [vmem:[%s1020_s0 + $0x88] sm:$0xff] }
  0x35   :  { %414 = vst [vmem:[%s1023_s3 + $0x40] sm:$0xff] %v350_v60  ;;  %v98_v13 = vmul.f32 %v502_v1, %v30_v0  ;;  %v99_v14 = vmul.f32 %v502_v1, %v31_v3 }
  0x36   :  { %415 = vst [vmem:[%s1023_s3 + $0x48] sm:$0xff] %v351_v4 }
  0x37   :  { %416 = vst [vmem:[%s1023_s3 + $0x50] sm:$0xff] %v352_v7  ;;  %v166_v19 = vadd.f32 %v507_v2, %v98_v13  ;;  %v167_v23 = vadd.f32 %v507_v2, %v99_v14 }
  0x38   :  { %417 = vst [vmem:[%s1023_s3 + $0x58] sm:$0xff] %v353_v11 }
  0x39   :  { %vm230_vm0 = vcmp.ge.f32.partialorder %v166_v19, 0.0  ;;  %v294_v29 = vmul.f32 0.1, %v166_v19  ;;  %vm231_vm1 = vcmp.ge.f32.partialorder %v167_v23, 0.0  ;;  %v295_v33 = vmul.f32 0.1, %v167_v23 }
  0x3b   :  { %v358_v36 = vsel %vm230_vm0, %v166_v19, %v294_v29  ;;  %v359_v40 = vsel %vm231_vm1, %v167_v23, %v295_v33 }
  0x3f   :  { %v32_v20 = vld [vmem:[%s1020_s0 + $0x90] sm:$0xff]  ;;  %v33_v24 = vld [vmem:[%s1020_s0 + $0x98] sm:$0xff]  ;;  %v34_v25 = vld [vmem:[%s1020_s0 + $0xa0] sm:$0xff] }
  0x40   :  { %v35_v26 = vld [vmem:[%s1020_s0 + $0xa8] sm:$0xff]  ;;  %v100_v34 = vmul.f32 %v502_v1, %v32_v20  ;;  %v101_v37 = vmul.f32 %v502_v1, %v33_v24  ;;  %v102_v38 = vmul.f32 %v502_v1, %v34_v25 }
  0x41   :  { %418 = vst [vmem:[%s1023_s3 + $0x60] sm:$0xff] %v354_v21  ;;  %v103_v39 = vmul.f32 %v502_v1, %v35_v26 }
  0x42   :  { %v168_v41 = vadd.f32 %v507_v2, %v100_v34  ;;  %v169_v44 = vadd.f32 %v507_v2, %v101_v37  ;;  %v170_v45 = vadd.f32 %v507_v2, %v102_v38 }
  0x43   :  { %v171_v46 = vadd.f32 %v507_v2, %v103_v39 }
  0x44   :  { %vm232_vm2 = vcmp.ge.f32.partialorder %v168_v41, 0.0  ;;  %v296_v48 = vmul.f32 0.1, %v168_v41  ;;  %vm233_vm3 = vcmp.ge.f32.partialorder %v169_v44, 0.0  ;;  %v297_v53 = vmul.f32 0.1, %v169_v44 }
  0x45   :  { %vm234_vm4 = vcmp.ge.f32.partialorder %v170_v45, 0.0  ;;  %v298_v54 = vmul.f32 0.1, %v170_v45  ;;  %vm235_vm5 = vcmp.ge.f32.partialorder %v171_v46, 0.0  ;;  %v299_v56 = vmul.f32 0.1, %v171_v46 }
  0x46   :  { %v360_v55 = vsel %vm232_vm2, %v168_v41, %v296_v48  ;;  %v361_v59 = vsel %vm233_vm3, %v169_v44, %v297_v53 }
  0x47   :  { %v362_v60 = vsel %vm234_vm4, %v170_v45, %v298_v54  ;;  %v363_v62 = vsel %vm235_vm5, %v171_v46, %v299_v56 }
  0x48   :  { %v36_v30 = vld [vmem:[%s1020_s0 + $0xb0] sm:$0xff]  ;;  %v37_v31 = vld [vmem:[%s1020_s0 + $0xb8] sm:$0xff] }
  0x49   :  { %419 = vst [vmem:[%s1023_s3 + $0x68] sm:$0xff] %v355_v27  ;;  %v104_v42 = vmul.f32 %v502_v1, %v36_v30  ;;  %v105_v43 = vmul.f32 %v502_v1, %v37_v31 }
  0x4b   :  { %v172_v49 = vadd.f32 %v507_v2, %v104_v42  ;;  %v173_v50 = vadd.f32 %v507_v2, %v105_v43 }
  0x4d   :  { %vm236_vm6 = vcmp.ge.f32.partialorder %v172_v49, 0.0  ;;  %v300_v61 = vmul.f32 0.1, %v172_v49  ;;  %vm237_vm7 = vcmp.ge.f32.partialorder %v173_v50, 0.0  ;;  %v301_v63 = vmul.f32 0.1, %v173_v50 }
  0x4f   :  { %v364_v5 = vsel %vm236_vm6, %v172_v49, %v300_v61  ;;  %v365_v10 = vsel %vm237_vm7, %v173_v50, %v301_v63 }
  0x50   :  { %v38_v35 = vld [vmem:[%s1020_s0 + $0xc0] sm:$0xff] }
  0x51   :  { %420 = vst [vmem:[%s1023_s3 + $0x70] sm:$0xff] %v356_v28  ;;  %v106_v47 = vmul.f32 %v502_v1, %v38_v35 }
  0x52   :  { %421 = vst [vmem:[%s1023_s3 + $0x78] sm:$0xff] %v357_v32 }
  0x53   :  { %422 = vst [vmem:[%s1023_s3 + $0x80] sm:$0xff] %v358_v36  ;;  %v174_v0 = vadd.f32 %v507_v2, %v106_v47 }
  0x54   :  { %423 = vst [vmem:[%s1023_s3 + $0x88] sm:$0xff] %v359_v40 }
  0x55   :  { %vm238_vm8 = vcmp.ge.f32.partialorder %v174_v0, 0.0  ;;  %v302_v11 = vmul.f32 0.1, %v174_v0 }
  0x57   :  { %v366_v17 = vsel %vm238_vm8, %v174_v0, %v302_v11 }
  0x5b   :  { %v39_v51 = vld [vmem:[%s1020_s0 + $0xc8] sm:$0xff]  ;;  %v40_v52 = vld [vmem:[%s1020_s0 + $0xd0] sm:$0xff]  ;;  %v41_v57 = vld [vmem:[%s1020_s0 + $0xd8] sm:$0xff] }
  0x5c   :  { %v42_v58 = vld [vmem:[%s1020_s0 + $0xe0] sm:$0xff]  ;;  %v107_v3 = vmul.f32 %v502_v1, %v39_v51  ;;  %v108_v6 = vmul.f32 %v502_v1, %v40_v52  ;;  %v109_v7 = vmul.f32 %v502_v1, %v41_v57 }
  0x5d   :  { %424 = vst [vmem:[%s1023_s3 + $0x90] sm:$0xff] %v360_v55  ;;  %v110_v8 = vmul.f32 %v502_v1, %v42_v58 }
  0x5e   :  { %425 = vst [vmem:[%s1023_s3 + $0x98] sm:$0xff] %v361_v59  ;;  %v175_v12 = vadd.f32 %v507_v2, %v107_v3  ;;  %v176_v13 = vadd.f32 %v507_v2, %v108_v6  ;;  %v177_v14 = vadd.f32 %v507_v2, %v109_v7 }
  0x5f   :  { %v178_v15 = vadd.f32 %v507_v2, %v110_v8 }
  0x60   :  { %vm239_vm9 = vcmp.ge.f32.partialorder %v175_v12, 0.0  ;;  %v303_v18 = vmul.f32 0.1, %v175_v12  ;;  %vm240_vm10 = vcmp.ge.f32.partialorder %v176_v13, 0.0  ;;  %v304_v22 = vmul.f32 0.1, %v176_v13 }
  0x61   :  { %vm241_vm11 = vcmp.ge.f32.partialorder %v177_v14, 0.0  ;;  %vm242_vm12 = vcmp.ge.f32.partialorder %v178_v15, 0.0  ;;  %v305_v24 = vmul.f32 0.1, %v177_v14  ;;  %v306_v25 = vmul.f32 0.1, %v178_v15 }
  0x62   :  { %v367_v23 = vsel %vm239_vm9, %v175_v12, %v303_v18  ;;  %v368_v27 = vsel %vm240_vm10, %v176_v13, %v304_v22 }
  0x63   :  { %v369_v34 = vsel %vm241_vm11, %v177_v14, %v305_v24  ;;  %v370_v35 = vsel %vm242_vm12, %v178_v15, %v306_v25 }
  0x65   :  { %v43_v4 = vld [vmem:[%s1020_s0 + $0xe8] sm:$0xff] }
  0x66   :  { %426 = vst [vmem:[%s1023_s3 + $0xa0] sm:$0xff] %v362_v60  ;;  %v111_v16 = vmul.f32 %v502_v1, %v43_v4 }
  0x68   :  { %v179_v26 = vadd.f32 %v507_v2, %v111_v16 }
  0x6a   :  { %vm243_vm13 = vcmp.ge.f32.partialorder %v179_v26, 0.0  ;;  %v307_v36 = vmul.f32 0.1, %v179_v26 }
  0x6c   :  { %v371_v40 = vsel %vm243_vm13, %v179_v26, %v307_v36 }
  0x6d   :  { %v44_v9 = vld [vmem:[%s1020_s0 + $0xf0] sm:$0xff] }
  0x6e   :  { %427 = vst [vmem:[%s1023_s3 + $0xa8] sm:$0xff] %v363_v62  ;;  %v112_v19 = vmul.f32 %v502_v1, %v44_v9 }
  0x6f   :  { %428 = vst [vmem:[%s1023_s3 + $0xb0] sm:$0xff] %v364_v5 }
  0x70   :  { %429 = vst [vmem:[%s1023_s3 + $0xb8] sm:$0xff] %v365_v10  ;;  %v180_v28 = vadd.f32 %v507_v2, %v112_v19 }
  0x72   :  { %vm244_vm14 = vcmp.ge.f32.partialorder %v180_v28, 0.0  ;;  %v308_v37 = vmul.f32 0.1, %v180_v28 }
  0x74   :  { %v372_v47 = vsel %vm244_vm14, %v180_v28, %v308_v37 }
  0x77   :  { %v45_v20 = vld [vmem:[%s1020_s0 + $0xf8] sm:$0xff]  ;;  %v46_v21 = vld [vmem:[%s1020_s0 + $0x100] sm:$0xff] }
  0x78   :  { %430 = vst [vmem:[%s1023_s3 + $0xc0] sm:$0xff] %v366_v17  ;;  %v113_v29 = vmul.f32 %v502_v1, %v45_v20  ;;  %v114_v30 = vmul.f32 %v502_v1, %v46_v21 }
  0x79   :  { %431 = vst [vmem:[%s1023_s3 + $0xc8] sm:$0xff] %v367_v23 }
  0x7a   :  { %v181_v38 = vadd.f32 %v507_v2, %v113_v29  ;;  %v182_v39 = vadd.f32 %v507_v2, %v114_v30 }
  0x7c   :  { %vm245_vm15 = vcmp.ge.f32.partialorder %v181_v38, 0.0  ;;  %v309_v48 = vmul.f32 0.1, %v181_v38  ;;  %vm246_vm0 = vcmp.ge.f32.partialorder %v182_v39, 0.0  ;;  %v310_v49 = vmul.f32 0.1, %v182_v39 }
  0x7e   :  { %v373_v53 = vsel %vm245_vm15, %v181_v38, %v309_v48  ;;  %v374_v58 = vsel %vm246_vm0, %v182_v39, %v310_v49 }
  0x80   :  { %v47_v31 = vld [vmem:[%s1020_s0 + $0x108] sm:$0xff]  ;;  %v48_v32 = vld [vmem:[%s1020_s0 + $0x110] sm:$0xff]  ;;  %v49_v33 = vld [vmem:[%s1020_s0 + $0x118] sm:$0xff] }
  0x81   :  { %432 = vst [vmem:[%s1023_s3 + $0xd0] sm:$0xff] %v368_v27  ;;  %v115_v41 = vmul.f32 %v502_v1, %v47_v31  ;;  %v116_v42 = vmul.f32 %v502_v1, %v48_v32  ;;  %v117_v43 = vmul.f32 %v502_v1, %v49_v33 }
  0x82   :  { %433 = vst [vmem:[%s1023_s3 + $0xd8] sm:$0xff] %v369_v34 }
  0x83   :  { %434 = vst [vmem:[%s1023_s3 + $0xe0] sm:$0xff] %v370_v35  ;;  %v183_v50 = vadd.f32 %v507_v2, %v115_v41  ;;  %v184_v51 = vadd.f32 %v507_v2, %v116_v42  ;;  %v185_v52 = vadd.f32 %v507_v2, %v117_v43 }
  0x85   :  { %vm247_vm1 = vcmp.ge.f32.partialorder %v183_v50, 0.0  ;;  %v311_v59 = vmul.f32 0.1, %v183_v50  ;;  %vm248_vm2 = vcmp.ge.f32.partialorder %v184_v51, 0.0  ;;  %v312_v60 = vmul.f32 0.1, %v184_v51 }
  0x86   :  { %vm249_vm3 = vcmp.ge.f32.partialorder %v185_v52, 0.0  ;;  %v313_v61 = vmul.f32 0.1, %v185_v52 }
  0x87   :  { %v375_v63 = vsel %vm247_vm1, %v183_v50, %v311_v59  ;;  %v376_v7 = vsel %vm248_vm2, %v184_v51, %v312_v60 }
  0x88   :  { %v377_v8 = vsel %vm249_vm3, %v185_v52, %v313_v61 }
  0x8a   :  { %v50_v44 = vld [vmem:[%s1020_s0 + $0x120] sm:$0xff]  ;;  %v51_v45 = vld [vmem:[%s1020_s0 + $0x128] sm:$0xff]  ;;  %v52_v46 = vld [vmem:[%s1020_s0 + $0x130] sm:$0xff] }
  0x8b   :  { %435 = vst [vmem:[%s1023_s3 + $0xe8] sm:$0xff] %v371_v40  ;;  %v118_v54 = vmul.f32 %v502_v1, %v50_v44  ;;  %v119_v55 = vmul.f32 %v502_v1, %v51_v45  ;;  %v120_v56 = vmul.f32 %v502_v1, %v52_v46 }
  0x8c   :  { %436 = vst [vmem:[%s1023_s3 + $0xf0] sm:$0xff] %v372_v47 }
  0x8d   :  { %v186_v62 = vadd.f32 %v507_v2, %v118_v54  ;;  %v187_v0 = vadd.f32 %v507_v2, %v119_v55  ;;  %v188_v3 = vadd.f32 %v507_v2, %v120_v56 }
  0x8f   :  { %vm250_vm4 = vcmp.ge.f32.partialorder %v186_v62, 0.0  ;;  %v314_v9 = vmul.f32 0.1, %v186_v62  ;;  %vm251_vm5 = vcmp.ge.f32.partialorder %v187_v0, 0.0  ;;  %v315_v11 = vmul.f32 0.1, %v187_v0 }
  0x90   :  { %vm252_vm6 = vcmp.ge.f32.partialorder %v188_v3, 0.0  ;;  %v316_v15 = vmul.f32 0.1, %v188_v3 }
  0x91   :  { %v378_v14 = vsel %vm250_vm4, %v186_v62, %v314_v9  ;;  %v379_v20 = vsel %vm251_vm5, %v187_v0, %v315_v11 }
  0x92   :  { %v380_v23 = vsel %vm252_vm6, %v188_v3, %v316_v15 }
  0x93   :  { %v53_v57 = vld [vmem:[%s1020_s0 + $0x138] sm:$0xff] }
  0x94   :  { %437 = vst [vmem:[%s1023_s3 + $0xf8] sm:$0xff] %v373_v53  ;;  %v121_v4 = vmul.f32 %v502_v1, %v53_v57 }
  0x95   :  { %438 = vst [vmem:[%s1023_s3 + $0x100] sm:$0xff] %v374_v58 }
  0x96   :  { %v189_v12 = vadd.f32 %v507_v2, %v121_v4 }
  0x98   :  { %vm253_vm7 = vcmp.ge.f32.partialorder %v189_v12, 0.0  ;;  %v317_v21 = vmul.f32 0.1, %v189_v12 }
  0x9a   :  { %v381_v27 = vsel %vm253_vm7, %v189_v12, %v317_v21 }
  0x9c   :  { %v54_v5 = vld [vmem:[%s1020_s0 + $0x140] sm:$0xff]  ;;  %v55_v6 = vld [vmem:[%s1020_s0 + $0x148] sm:$0xff] }
  0x9d   :  { %439 = vst [vmem:[%s1023_s3 + $0x108] sm:$0xff] %v375_v63  ;;  %v122_v16 = vmul.f32 %v502_v1, %v54_v5  ;;  %v123_v17 = vmul.f32 %v502_v1, %v55_v6 }
  0x9f   :  { %v190_v24 = vadd.f32 %v507_v2, %v122_v16  ;;  %v191_v25 = vadd.f32 %v507_v2, %v123_v17 }
  0xa1   :  { %vm254_vm8 = vcmp.ge.f32.partialorder %v190_v24, 0.0  ;;  %v318_v31 = vmul.f32 0.1, %v190_v24  ;;  %vm255_vm9 = vcmp.ge.f32.partialorder %v191_v25, 0.0  ;;  %v319_v33 = vmul.f32 0.1, %v191_v25 }
  0xa3   :  { %v382_v37 = vsel %vm254_vm8, %v190_v24, %v318_v31  ;;  %v383_v43 = vsel %vm255_vm9, %v191_v25, %v319_v33 }
  0xa4   :  { %v56_v10 = vld [vmem:[%s1020_s0 + $0x150] sm:$0xff] }
  0xa5   :  { %440 = vst [vmem:[%s1023_s3 + $0x110] sm:$0xff] %v376_v7  ;;  %v124_v22 = vmul.f32 %v502_v1, %v56_v10 }
  0xa7   :  { %v192_v28 = vadd.f32 %v507_v2, %v124_v22 }
  0xa9   :  { %vm256_vm10 = vcmp.ge.f32.partialorder %v192_v28, 0.0  ;;  %v320_v34 = vmul.f32 0.1, %v192_v28 }
  0xab   :  { %v384_v44 = vsel %vm256_vm10, %v192_v28, %v320_v34 }
  0xac   :  { %v57_v13 = vld [vmem:[%s1020_s0 + $0x158] sm:$0xff] }
  0xad   :  { %441 = vst [vmem:[%s1023_s3 + $0x118] sm:$0xff] %v377_v8  ;;  %v125_v26 = vmul.f32 %v502_v1, %v57_v13 }
  0xaf   :  { %v193_v32 = vadd.f32 %v507_v2, %v125_v26 }
  0xb1   :  { %vm257_vm11 = vcmp.ge.f32.partialorder %v193_v32, 0.0  ;;  %v321_v38 = vmul.f32 0.1, %v193_v32 }
  0xb3   :  { %v385_v48 = vsel %vm257_vm11, %v193_v32, %v321_v38 }
  0xb4   :  { %v58_v18 = vld [vmem:[%s1020_s0 + $0x160] sm:$0xff]  ;;  %v59_v19 = vld [vmem:[%s1020_s0 + $0x168] sm:$0xff] }
  0xb5   :  { %442 = vst [vmem:[%s1023_s3 + $0x120] sm:$0xff] %v378_v14  ;;  %v126_v29 = vmul.f32 %v502_v1, %v58_v18  ;;  %v127_v30 = vmul.f32 %v502_v1, %v59_v19 }
  0xb6   :  { %443 = vst [vmem:[%s1023_s3 + $0x128] sm:$0xff] %v379_v20 }
  0xb7   :  { %444 = vst [vmem:[%s1023_s3 + $0x130] sm:$0xff] %v380_v23  ;;  %v194_v35 = vadd.f32 %v507_v2, %v126_v29  ;;  %v195_v39 = vadd.f32 %v507_v2, %v127_v30 }
  0xb8   :  { %445 = vst [vmem:[%s1023_s3 + $0x138] sm:$0xff] %v381_v27 }
  0xb9   :  { %vm258_vm12 = vcmp.ge.f32.partialorder %v194_v35, 0.0  ;;  %v322_v45 = vmul.f32 0.1, %v194_v35  ;;  %vm259_vm13 = vcmp.ge.f32.partialorder %v195_v39, 0.0  ;;  %v323_v49 = vmul.f32 0.1, %v195_v39 }
  0xbb   :  { %v386_v52 = vsel %vm258_vm12, %v194_v35, %v322_v45  ;;  %v387_v56 = vsel %vm259_vm13, %v195_v39, %v323_v49 }
  0xbf   :  { %v60_v36 = vld [vmem:[%s1020_s0 + $0x170] sm:$0xff]  ;;  %v61_v40 = vld [vmem:[%s1020_s0 + $0x178] sm:$0xff]  ;;  %v62_v41 = vld [vmem:[%s1020_s0 + $0x180] sm:$0xff] }
  0xc0   :  { %v63_v42 = vld [vmem:[%s1020_s0 + $0x188] sm:$0xff]  ;;  %v128_v50 = vmul.f32 %v502_v1, %v60_v36  ;;  %v129_v53 = vmul.f32 %v502_v1, %v61_v40  ;;  %v130_v54 = vmul.f32 %v502_v1, %v62_v41 }
  0xc1   :  { %446 = vst [vmem:[%s1023_s3 + $0x140] sm:$0xff] %v382_v37  ;;  %v131_v55 = vmul.f32 %v502_v1, %v63_v42 }
  0xc2   :  { %v196_v57 = vadd.f32 %v507_v2, %v128_v50  ;;  %v197_v60 = vadd.f32 %v507_v2, %v129_v53  ;;  %v198_v61 = vadd.f32 %v507_v2, %v130_v54 }
  0xc3   :  { %v199_v62 = vadd.f32 %v507_v2, %v131_v55 }
  0xc4   :  { %vm260_vm14 = vcmp.ge.f32.partialorder %v196_v57, 0.0  ;;  %v324_v0 = vmul.f32 0.1, %v196_v57  ;;  %vm261_vm15 = vcmp.ge.f32.partialorder %v197_v60, 0.0  ;;  %v325_v7 = vmul.f32 0.1, %v197_v60 }
  0xc5   :  { %vm262_vm0 = vcmp.ge.f32.partialorder %v198_v61, 0.0  ;;  %v326_v8 = vmul.f32 0.1, %v198_v61  ;;  %vm263_vm1 = vcmp.ge.f32.partialorder %v199_v62, 0.0  ;;  %v327_v10 = vmul.f32 0.1, %v199_v62 }
  0xc6   :  { %v388_v9 = vsel %vm260_vm14, %v196_v57, %v324_v0  ;;  %v389_v13 = vsel %vm261_vm15, %v197_v60, %v325_v7 }
  0xc7   :  { %v390_v14 = vsel %vm262_vm0, %v198_v61, %v326_v8  ;;  %v391_v16 = vsel %vm263_vm1, %v199_v62, %v327_v10 }
  0xc8   :  { %v64_v46 = vld [vmem:[%s1020_s0 + $0x190] sm:$0xff]  ;;  %v65_v47 = vld [vmem:[%s1020_s0 + $0x198] sm:$0xff] }
  0xc9   :  { %447 = vst [vmem:[%s1023_s3 + $0x148] sm:$0xff] %v383_v43  ;;  %v132_v58 = vmul.f32 %v502_v1, %v64_v46  ;;  %v133_v59 = vmul.f32 %v502_v1, %v65_v47 }
  0xcb   :  { %v200_v3 = vadd.f32 %v507_v2, %v132_v58  ;;  %v201_v4 = vadd.f32 %v507_v2, %v133_v59 }
  0xcd   :  { %vm264_vm2 = vcmp.ge.f32.partialorder %v200_v3, 0.0  ;;  %v328_v15 = vmul.f32 0.1, %v200_v3  ;;  %vm265_vm3 = vcmp.ge.f32.partialorder %v201_v4, 0.0  ;;  %v329_v17 = vmul.f32 0.1, %v201_v4 }
  0xcf   :  { %v392_v21 = vsel %vm264_vm2, %v200_v3, %v328_v15  ;;  %v393_v26 = vsel %vm265_vm3, %v201_v4, %v329_v17 }
  0xd0   :  { %v66_v51 = vld [vmem:[%s1020_s0 + $0x1a0] sm:$0xff] }
  0xd1   :  { %448 = vst [vmem:[%s1023_s3 + $0x150] sm:$0xff] %v384_v44  ;;  %v134_v63 = vmul.f32 %v502_v1, %v66_v51 }
  0xd2   :  { %449 = vst [vmem:[%s1023_s3 + $0x158] sm:$0xff] %v385_v48 }
  0xd3   :  { %450 = vst [vmem:[%s1023_s3 + $0x160] sm:$0xff] %v386_v52  ;;  %v202_v18 = vadd.f32 %v507_v2, %v134_v63 }
  0xd4   :  { %451 = vst [vmem:[%s1023_s3 + $0x168] sm:$0xff] %v387_v56 }
  0xd5   :  { %vm266_vm4 = vcmp.ge.f32.partialorder %v202_v18, 0.0  ;;  %v330_v27 = vmul.f32 0.1, %v202_v18 }
  0xd7   :  { %v394_v33 = vsel %vm266_vm4, %v202_v18, %v330_v27 }
  0xdb   :  { %v67_v5 = vld [vmem:[%s1020_s0 + $0x1a8] sm:$0xff]  ;;  %v68_v6 = vld [vmem:[%s1020_s0 + $0x1b0] sm:$0xff]  ;;  %v69_v11 = vld [vmem:[%s1020_s0 + $0x1b8] sm:$0xff] }
  0xdc   :  { %v70_v12 = vld [vmem:[%s1020_s0 + $0x1c0] sm:$0xff]  ;;  %v135_v19 = vmul.f32 %v502_v1, %v67_v5  ;;  %v136_v22 = vmul.f32 %v502_v1, %v68_v6  ;;  %v137_v23 = vmul.f32 %v502_v1, %v69_v11 }
  0xdd   :  { %452 = vst [vmem:[%s1023_s3 + $0x170] sm:$0xff] %v388_v9  ;;  %v138_v24 = vmul.f32 %v502_v1, %v70_v12 }
  0xde   :  { %453 = vst [vmem:[%s1023_s3 + $0x178] sm:$0xff] %v389_v13  ;;  %v203_v28 = vadd.f32 %v507_v2, %v135_v19  ;;  %v204_v29 = vadd.f32 %v507_v2, %v136_v22  ;;  %v205_v30 = vadd.f32 %v507_v2, %v137_v23 }
  0xdf   :  { %v206_v31 = vadd.f32 %v507_v2, %v138_v24 }
  0xe0   :  { %vm267_vm5 = vcmp.ge.f32.partialorder %v203_v28, 0.0  ;;  %v331_v34 = vmul.f32 0.1, %v203_v28  ;;  %vm268_vm6 = vcmp.ge.f32.partialorder %v204_v29, 0.0  ;;  %v332_v38 = vmul.f32 0.1, %v204_v29 }
  0xe1   :  { %vm269_vm7 = vcmp.ge.f32.partialorder %v205_v30, 0.0  ;;  %vm270_vm8 = vcmp.ge.f32.partialorder %v206_v31, 0.0  ;;  %v333_v40 = vmul.f32 0.1, %v205_v30  ;;  %v334_v41 = vmul.f32 0.1, %v206_v31 }
  0xe2   :  { %v395_v39 = vsel %vm267_vm5, %v203_v28, %v331_v34  ;;  %v396_v43 = vsel %vm268_vm6, %v204_v29, %v332_v38 }
  0xe3   :  { %v397_v50 = vsel %vm269_vm7, %v205_v30, %v333_v40  ;;  %v398_v51 = vsel %vm270_vm8, %v206_v31, %v334_v41 }
  0xe5   :  { %v71_v20 = vld [vmem:[%s1020_s0 + $0x1c8] sm:$0xff] }
  0xe6   :  { %454 = vst [vmem:[%s1023_s3 + $0x180] sm:$0xff] %v390_v14  ;;  %v139_v32 = vmul.f32 %v502_v1, %v71_v20 }
  0xe8   :  { %v207_v42 = vadd.f32 %v507_v2, %v139_v32 }
  0xea   :  { %vm271_vm9 = vcmp.ge.f32.partialorder %v207_v42, 0.0  ;;  %v335_v52 = vmul.f32 0.1, %v207_v42 }
  0xec   :  { %v399_v56 = vsel %vm271_vm9, %v207_v42, %v335_v52 }
  0xed   :  { %v72_v25 = vld [vmem:[%s1020_s0 + $0x1d0] sm:$0xff] }
  0xee   :  { %455 = vst [vmem:[%s1023_s3 + $0x188] sm:$0xff] %v391_v16  ;;  %v140_v35 = vmul.f32 %v502_v1, %v72_v25 }
  0xef   :  { %456 = vst [vmem:[%s1023_s3 + $0x190] sm:$0xff] %v392_v21 }
  0xf0   :  { %457 = vst [vmem:[%s1023_s3 + $0x198] sm:$0xff] %v393_v26  ;;  %v208_v44 = vadd.f32 %v507_v2, %v140_v35 }
  0xf2   :  { %vm272_vm10 = vcmp.ge.f32.partialorder %v208_v44, 0.0  ;;  %v336_v53 = vmul.f32 0.1, %v208_v44 }
  0xf4   :  { %v400_v60 = vsel %vm272_vm10, %v208_v44, %v336_v53 }
  0xf7   :  { %v73_v36 = vld [vmem:[%s1020_s0 + $0x1d8] sm:$0xff]  ;;  %v74_v37 = vld [vmem:[%s1020_s0 + $0x1e0] sm:$0xff] }
  0xf8   :  { %458 = vst [vmem:[%s1023_s3 + $0x1a0] sm:$0xff] %v394_v33  ;;  %v141_v45 = vmul.f32 %v502_v1, %v73_v36  ;;  %v142_v46 = vmul.f32 %v502_v1, %v74_v37 }
  0xf9   :  { %459 = vst [vmem:[%s1023_s3 + $0x1a8] sm:$0xff] %v395_v39 }
  0xfa   :  { %v209_v54 = vadd.f32 %v507_v2, %v141_v45  ;;  %v210_v55 = vadd.f32 %v507_v2, %v142_v46 }
  0xfc   :  { %vm273_vm11 = vcmp.ge.f32.partialorder %v209_v54, 0.0  ;;  %v337_v61 = vmul.f32 0.1, %v209_v54  ;;  %vm274_vm12 = vcmp.ge.f32.partialorder %v210_v55, 0.0  ;;  %v338_v62 = vmul.f32 0.1, %v210_v55 }
  0xfe   :  { %v402_v4 = vsel %vm274_vm12, %v210_v55, %v338_v62 }
 0x100   :  { %v75_v47 = vld [vmem:[%s1020_s0 + $0x1e8] sm:$0xff]  ;;  %v76_v48 = vld [vmem:[%s1020_s0 + $0x1f0] sm:$0xff]  ;;  %v77_v49 = vld [vmem:[%s1020_s0 + $0x1f8] sm:$0xff] }
 0x101   :  { %460 = vst [vmem:[%s1023_s3 + $0x1b0] sm:$0xff] %v396_v43  ;;  %v143_v57 = vmul.f32 %v502_v1, %v75_v47  ;;  %v144_v58 = vmul.f32 %v502_v1, %v76_v48  ;;  %v145_v59 = vmul.f32 %v502_v1, %v77_v49  ;;  %v401_v1 = vsel %vm273_vm11, %v209_v54, %v337_v61 }
 0x102   :  { %461 = vst [vmem:[%s1023_s3 + $0x1b8] sm:$0xff] %v397_v50 }
 0x103   :  { %462 = vst [vmem:[%s1023_s3 + $0x1c0] sm:$0xff] %v398_v51  ;;  %v211_v63 = vadd.f32 %v507_v2, %v143_v57  ;;  %v212_v0 = vadd.f32 %v507_v2, %v144_v58  ;;  %v213_v3 = vadd.f32 %v507_v2, %v145_v59 }
 0x104   :  { %463 = vst [vmem:[%s1023_s3 + $0x1c8] sm:$0xff] %v399_v56 }
 0x105   :  { %464 = vst [vmem:[%s1023_s3 + $0x1d0] sm:$0xff] %v400_v60  ;;  %vm275_vm13 = vcmp.ge.f32.partialorder %v211_v63, 0.0  ;;  %v339_v5 = vmul.f32 0.1, %v211_v63  ;;  %vm276_vm14 = vcmp.ge.f32.partialorder %v212_v0, 0.0  ;;  %vm277_vm15 = vcmp.ge.f32.partialorder %v213_v3, 0.0 }
 0x106   :  { %465 = vst [vmem:[%s1023_s3 + $0x1d8] sm:$0xff] %v401_v1  ;;  %v340_v6 = vmul.f32 0.1, %v212_v0  ;;  %v341_v7 = vmul.f32 0.1, %v213_v3 }
 0x107   :  { %466 = vst [vmem:[%s1023_s3 + $0x1e0] sm:$0xff] %v402_v4  ;;  %v403_v8 = vsel %vm275_vm13, %v211_v63, %v339_v5 }
 0x108   :  { %467 = vst [vmem:[%s1023_s3 + $0x1e8] sm:$0xff] %v403_v8  ;;  %v404_v2 = vsel %vm276_vm14, %v212_v0, %v340_v6  ;;  %v405_v9 = vsel %vm277_vm15, %v213_v3, %v341_v7 }
 0x109   :  { %468 = vst [vmem:[%s1023_s3 + $0x1f0] sm:$0xff] %v404_v2 }
 0x10a   :  { %469 = vst [vmem:[%s1023_s3 + $0x1f8] sm:$0xff] %v405_v9 }

</bundles_post_ra>
